<compile_context>
chip_gen: v7x
topology: tpu7x:2x2x1
jax: 0.10.0
libtpu: 0.0.40
codegen_flags: <defaults>
</compile_context>

<pallas_src>
import jax
import jax.numpy as jnp
from jax.experimental import pallas as pl
from jax.experimental.pallas import tpu as pltpu


# ----------------------------------------------------------------------------
# helpers
# ----------------------------------------------------------------------------
def _round_up(x, m):
    return ((x + m - 1) // m) * m


def _pad2(x, rows, cols):
    return jnp.pad(x, ((0, rows - x.shape[0]), (0, cols - x.shape[1])))


def _choose_tiles(n, h_pad):
    """Stage-2 tiling: returns (N_pad, TM, TK), TM|N_pad and TK|N_pad."""
    if n <= 4096:
        # small/medium graphs: pad to a multiple of 256 so TM never drops
        # below 256; single K step (support strip is small).
        n_pad = _round_up(n, 256)
        for tm in (1024, 512, 256):
            if n_pad % tm == 0:
                return n_pad, tm, n_pad
        return n_pad, 256, n_pad  # unreachable (n_pad is a multiple of 256)
    # large graphs: stream adj in (TM, TK) tiles; keep double-buffered
    # footprint <= ~40 MiB so the same tiling fits v7x's 64 MiB VMEM.
    tk = 1024
    n_pad = _round_up(n, tk)
    budget = 40 * 1024 * 1024
    for tm in (2048, 1024):
        if n_pad % tm:
            continue
        vmem = (2 * tm * tk * 2          # adj tiles (bf16, double-buffered)
                + 2 * tk * h_pad * 2     # support strips (bf16)
                + 2 * tm * h_pad * 4)    # f32 output block
        if vmem <= budget:
            return n_pad, tm, tk
    return n_pad, 512, tk


def _stage1_row_tiles(rows, f_pad):
    """Row padding + row-tile size for the per-node-type support kernel."""
    if rows <= 512:
        rows_pad = _round_up(rows, 16)      # bf16 sublane packing
        return rows_pad, rows_pad           # single full-array block
    for tm in (512, 256, 128):
        if 2 * tm * f_pad * 2 <= 8 * 1024 * 1024:   # double-buffered bf16 tile
            return _round_up(rows, tm), tm
    return _round_up(rows, 128), 128


# ----------------------------------------------------------------------------
# Stage 1: support rows for one node type:  ((feat @ W + b) @ Wg)  -> bf16
# ----------------------------------------------------------------------------
def support_kernel(x_ref, w_ref, b_ref, wg_ref, sup_ref):
    h = jnp.dot(x_ref[...], w_ref[...],
                preferred_element_type=jnp.float32) + b_ref[...]
    sup_ref[...] = jnp.dot(h.astype(jnp.bfloat16), wg_ref[...],
                           preferred_element_type=jnp.float32
                           ).astype(sup_ref.dtype)


def _linear_support(feat, w, b, wg, f_pad, h_pad):
    rows = feat.shape[0]
    rows_pad, tm = _stage1_row_tiles(rows, f_pad)
    x = _pad2(feat, rows_pad, f_pad).astype(jnp.bfloat16)
    return pl.pallas_call(
        support_kernel,
        grid=(rows_pad // tm,),
        out_shape=jax.ShapeDtypeStruct((rows_pad, h_pad), jnp.bfloat16),
        in_specs=[pl.BlockSpec((tm, f_pad), lambda i: (i, 0)),   # feat rows
                  pl.BlockSpec(w.shape, lambda i: (0, 0)),       # W  (resident)
                  pl.BlockSpec(b.shape, lambda i: (0, 0)),       # b  (resident)
                  pl.BlockSpec(wg.shape, lambda i: (0, 0))],     # Wg (resident)
        out_specs=pl.BlockSpec((tm, h_pad), lambda i: (i, 0)),
        compiler_params=pltpu.CompilerParams(
            dimension_semantics=("parallel",),
            vmem_limit_bytes=48 * 1024 * 1024),
    )(x, w, b, wg)


# ----------------------------------------------------------------------------
# Stage 2: out = relu(adj @ support + bg), tiled over (row, K) grid.
# Accumulates directly in the (K-resident) f32 output block — no scratch.
# ----------------------------------------------------------------------------
def gconv_kernel(adj_ref, sup_ref, bg_ref, out_ref):
    k = pl.program_id(1)

    @pl.when(k == 0)
    def _init():
        out_ref[...] = jnp.zeros_like(out_ref)

    out_ref[...] += jnp.dot(adj_ref[...], sup_ref[...],
                            preferred_element_type=jnp.float32)

    @pl.when(k == pl.num_programs(1) - 1)
    def _finalize():
        out_ref[...] = jnp.maximum(out_ref[...] + bg_ref[...], 0.0)


# ----------------------------------------------------------------------------
# wrapper
# ----------------------------------------------------------------------------
def gcn_forward(p_feat, d_feat, adj, params):
    Np, Pf = p_feat.shape
    Nd, Df = d_feat.shape
    H = params["wp"].shape[1]
    N = Np + Nd

    Pf_pad = _round_up(Pf, 128)
    Df_pad = _round_up(Df, 128)
    H_pad = _round_up(H, 128)
    N_pad, TM, TK = _choose_tiles(N, H_pad)

    bf16 = jnp.bfloat16
    f32 = jnp.float32

    # Weights in bf16 (native MXU dtype); biases stay f32.
    wp = _pad2(params["wp"], Pf_pad, H_pad).astype(bf16)
    wd = _pad2(params["wd"], Df_pad, H_pad).astype(bf16)
    wg = _pad2(params["wg"], H_pad, H_pad).astype(bf16)
    bp = _pad2(params["bp"].reshape(1, H).astype(f32), 1, H_pad)
    bd = _pad2(params["bd"].reshape(1, H).astype(f32), 1, H_pad)
    bg = _pad2(params["bg"].reshape(1, H).astype(f32), 1, H_pad)

    # ---- Stage 1: per-node-type linear + (@ Wg), row tiled, bf16 output.
    sup_p = _linear_support(p_feat, wp, bp, wg, Pf_pad, H_pad)
    sup_d = _linear_support(d_feat, wd, bd, wg, Df_pad, H_pad)

    # vstack + zero-pad (padded support rows are exactly zero).
    support = jnp.concatenate(
        [sup_p[:Np], sup_d[:Nd],
         jnp.zeros((N_pad - N, H_pad), bf16)], axis=0)

    # ---- adj: single fused zero-pad + bf16 cast.  Callers running many
    # forwards on a fixed graph should hoist this and pass a pre-padded bf16
    # adj of shape (N_pad, N_pad) — it is then used as-is.
    if adj.shape == (N_pad, N_pad) and adj.dtype == bf16:
        adj_pad = adj
    else:
        adj_pad = jnp.pad(adj, ((0, N_pad - N), (0, N_pad - N))).astype(bf16)

    # ---- Stage 2: relu(adj @ support + bg), row-tiled + K-accumulated.
    grid = (N_pad // TM, N_pad // TK)
    cost = pl.CostEstimate(
        flops=2 * N_pad * N_pad * H_pad,
        transcendentals=0,
        bytes_accessed=(N_pad * N_pad * 2                       # adj (bf16)
                        + (N_pad // TM) * N_pad * H_pad * 2     # support re-reads
                        + H_pad * 4                             # bias
                        + N_pad * H_pad * 4),                   # output (f32)
    )
    out_pad = pl.pallas_call(
        gconv_kernel,
        out_shape=jax.ShapeDtypeStruct((N_pad, H_pad), jnp.float32),
        grid_spec=pltpu.PrefetchScalarGridSpec(
            num_scalar_prefetch=0,
            grid=grid,
            in_specs=[pl.BlockSpec((TM, TK), lambda i, k: (i, k)),      # adj tile
                      pl.BlockSpec((TK, H_pad), lambda i, k: (k, 0)),   # support strip
                      pl.BlockSpec((1, H_pad), lambda i, k: (0, 0))],   # bias
            out_specs=pl.BlockSpec((TM, H_pad), lambda i, k: (i, 0))),
        compiler_params=pltpu.CompilerParams(
            dimension_semantics=("parallel", "arbitrary"),
            vmem_limit_bytes=48 * 1024 * 1024),
        cost_estimate=cost,
    )(adj_pad, support, bg)

    # TODO(synk): F.dropout with training=True (stochastic masking) not
    #             implemented; this matches eval-mode semantics (identity).

    p_out = out_pad[:Np, :H]
    d_out = out_pad[Np:N, :H]
    return p_out, d_out


# ----------------------------------------------------------------------------
# parameter init (matches PyTorch module inits; weights stored pre-transposed)
# ----------------------------------------------------------------------------
def init_params(key, p_feat_dim, d_feat_dim, n_hidden):
    ks = jax.random.split(key, 6)
    s_p = 1.0 / jnp.sqrt(p_feat_dim)   # nn.Linear default: U(-1/sqrt(in), 1/sqrt(in))
    s_d = 1.0 / jnp.sqrt(d_feat_dim)
    s_g = 1.0 / jnp.sqrt(n_hidden)     # GraphConvolution: U(-1/sqrt(out), 1/sqrt(out))
    return {
        "wp": jax.random.uniform(ks[0], (p_feat_dim, n_hidden),
                                 minval=-s_p, maxval=s_p, dtype=jnp.float32),
        "bp": jax.random.uniform(ks[1], (n_hidden,),
                                 minval=-s_p, maxval=s_p, dtype=jnp.float32),
        "wd": jax.random.uniform(ks[2], (d_feat_dim, n_hidden),
                                 minval=-s_d, maxval=s_d, dtype=jnp.float32),
        "bd": jax.random.uniform(ks[3], (n_hidden,),
                                 minval=-s_d, maxval=s_d, dtype=jnp.float32),
        "wg": jax.random.uniform(ks[4], (n_hidden, n_hidden),
                                 minval=-s_g, maxval=s_g, dtype=jnp.float32),
        "bg": jax.random.uniform(ks[5], (n_hidden,),
                                 minval=-s_g, maxval=s_g, dtype=jnp.float32),
    }


if __name__ == "__main__":
    # small deterministic example shapes (exercise row/lane padding)
    Np, Nd = 20, 12
    p_feat_dim, d_feat_dim, n_hidden = 16, 24, 32

    key = jax.random.PRNGKey(0)
    k_p, k_d, k_adj, k_params = jax.random.split(key, 4)

    p_feat = jax.random.normal(k_p, (Np, p_feat_dim), dtype=jnp.float32)
    d_feat = jax.random.normal(k_d, (Nd, d_feat_dim), dtype=jnp.float32)
    adj = jax.random.uniform(k_adj, (Np + Nd, Np + Nd), dtype=jnp.float32)

    params = init_params(k_params, p_feat_dim, d_feat_dim, n_hidden)

    fwd = jax.jit(gcn_forward)
    p_out, d_out = fwd(p_feat, d_feat, adj, params)
    jax.block_until_ready((p_out, d_out))

    # plain-JAX f32 reference (module semantics; dropout eval-mode = identity)
    p_h = p_feat @ params["wp"] + params["bp"]
    d_h = d_feat @ params["wd"] + params["bd"]
    x = jnp.vstack((p_h, d_h))
    ref = jnp.maximum(adj @ (x @ params["wg"]) + params["bg"], 0.0)

    assert p_out.shape == (Np, n_hidden) and d_out.shape == (Nd, n_hidden)
    # kernels run all matmuls with bf16 operands (f32 accumulation), so compare
    # against the f32 module reference with mixed-precision tolerance.
    assert jnp.allclose(p_out, ref[:Np], atol=2e-1, rtol=5e-2)
    assert jnp.allclose(d_out, ref[Np:], atol=2e-1, rtol=5e-2)

    print("KERNEL_OK")
</pallas_src>

<mosaic_0001>
module attributes {stable_mosaic.version = 11 : i64} {
  func.func @support_kernel(%arg0: i32, %arg1: memref<16x128xbf16, #tpu.memory_space<vmem>>, %arg2: memref<128x128xbf16, #tpu.memory_space<vmem>>, %arg3: memref<1x128xf32, #tpu.memory_space<vmem>>, %arg4: memref<128x128xbf16, #tpu.memory_space<vmem>>, %arg5: memref<16x128xbf16, #tpu.memory_space<vmem>>) attributes {dimension_semantics = [#tpu.dimension_semantics<parallel>], iteration_bounds = array<i64: 1>, scalar_prefetch = 0 : i64, scratch_operands = 0 : i64, tpu.core_type = #tpu.core_type<tc>, window_params = [{transform_indices = @transform_0, window_bounds = array<i64: 16, 128>}, {pipeline_mode = #tpu.pipeline_mode<synchronous>, transform_indices = @transform_1, window_bounds = array<i64: 128, 128>}, {pipeline_mode = #tpu.pipeline_mode<synchronous>, transform_indices = @transform_2, window_bounds = array<i64: 1, 128>}, {pipeline_mode = #tpu.pipeline_mode<synchronous>, transform_indices = @transform_3, window_bounds = array<i64: 128, 128>}, {transform_indices = @transform_4, window_bounds = array<i64: 16, 128>}]} {
    %c0 = arith.constant 0 : index
    %c0_0 = arith.constant 0 : index
    %0 = vector.load %arg1[%c0, %c0_0] : memref<16x128xbf16, #tpu.memory_space<vmem>>, vector<16x128xbf16>
    %c0_1 = arith.constant 0 : index
    %c0_2 = arith.constant 0 : index
    %1 = vector.load %arg2[%c0_1, %c0_2] : memref<128x128xbf16, #tpu.memory_space<vmem>>, vector<128x128xbf16>
    %cst = arith.constant dense<0.000000e+00> : vector<16x128xf32>
    %2 = tpu.matmul %0, %1, %cst {dimension_numbers = #tpu.dot_dimension_numbers<[1], [0], [0], [1], [0, 0, 1, 1], [], []>} : vector<16x128xbf16>, vector<128x128xbf16>, vector<16x128xf32> -> vector<16x128xf32>
    %c0_3 = arith.constant 0 : index
    %c0_4 = arith.constant 0 : index
    %3 = vector.load %arg3[%c0_3, %c0_4] : memref<1x128xf32, #tpu.memory_space<vmem>>, vector<1x128xf32>
    %4 = vector.broadcast %3 : vector<1x128xf32> to vector<16x128xf32>
    %5 = arith.addf %2, %4 : vector<16x128xf32>
    %6 = arith.truncf %5 : vector<16x128xf32> to vector<16x128xbf16>
    %c0_5 = arith.constant 0 : index
    %c0_6 = arith.constant 0 : index
    %7 = vector.load %arg4[%c0_5, %c0_6] : memref<128x128xbf16, #tpu.memory_space<vmem>>, vector<128x128xbf16>
    %cst_7 = arith.constant dense<0.000000e+00> : vector<16x128xf32>
    %8 = tpu.matmul %6, %7, %cst_7 {dimension_numbers = #tpu.dot_dimension_numbers<[1], [0], [0], [1], [0, 0, 1, 1], [], []>} : vector<16x128xbf16>, vector<128x128xbf16>, vector<16x128xf32> -> vector<16x128xf32>
    %9 = arith.truncf %8 : vector<16x128xf32> to vector<16x128xbf16>
    %c0_8 = arith.constant 0 : index
    %c0_9 = arith.constant 0 : index
    %10 = vector.load %arg5[%c0_8, %c0_9] : memref<16x128xbf16, #tpu.memory_space<vmem>>, vector<16x128xbf16>
    tpu.vector_store %arg5[%c0_8, %c0_9], %9 {strides = array<i32>} : memref<16x128xbf16, #tpu.memory_space<vmem>>, vector<16x128xbf16>,
    return
  }
  func.func @transform_0(%arg0: i32) -> (i32, i32) {
    %c0_i32 = arith.constant 0 : i32
    %c0_i32_0 = arith.constant 0 : i32
    return %arg0, %c0_i32 : i32, i32
  }
  func.func @transform_1(%arg0: i32) -> (i32, i32) {
    %c0_i32 = arith.constant 0 : i32
    %c0_i32_0 = arith.constant 0 : i32
    %c0_i32_1 = arith.constant 0 : i32
    return %c0_i32, %c0_i32_0 : i32, i32
  }
  func.func @transform_2(%arg0: i32) -> (i32, i32) {
    %c0_i32 = arith.constant 0 : i32
    %c0_i32_0 = arith.constant 0 : i32
    %c0_i32_1 = arith.constant 0 : i32
    return %c0_i32, %c0_i32_0 : i32, i32
  }
  func.func @transform_3(%arg0: i32) -> (i32, i32) {
    %c0_i32 = arith.constant 0 : i32
    %c0_i32_0 = arith.constant 0 : i32
    %c0_i32_1 = arith.constant 0 : i32
    return %c0_i32, %c0_i32_0 : i32, i32
  }
  func.func @transform_4(%arg0: i32) -> (i32, i32) {
    %c0_i32 = arith.constant 0 : i32
    %c0_i32_0 = arith.constant 0 : i32
    return %arg0, %c0_i32 : i32, i32
  }
}

module attributes {stable_mosaic.version = 11 : i64} {
  func.func @support_kernel(%arg0: i32, %arg1: memref<32x128xbf16, #tpu.memory_space<vmem>>, %arg2: memref<128x128xbf16, #tpu.memory_space<vmem>>, %arg3: memref<1x128xf32, #tpu.memory_space<vmem>>, %arg4: memref<128x128xbf16, #tpu.memory_space<vmem>>, %arg5: memref<32x128xbf16, #tpu.memory_space<vmem>>) attributes {dimension_semantics = [#tpu.dimension_semantics<parallel>], iteration_bounds = array<i64: 1>, scalar_prefetch = 0 : i64, scratch_operands = 0 : i64, tpu.core_type = #tpu.core_type<tc>, window_params = [{transform_indices = @transform_0, window_bounds = array<i64: 32, 128>}, {pipeline_mode = #tpu.pipeline_mode<synchronous>, transform_indices = @transform_1, window_bounds = array<i64: 128, 128>}, {pipeline_mode = #tpu.pipeline_mode<synchronous>, transform_indices = @transform_2, window_bounds = array<i64: 1, 128>}, {pipeline_mode = #tpu.pipeline_mode<synchronous>, transform_indices = @transform_3, window_bounds = array<i64: 128, 128>}, {transform_indices = @transform_4, window_bounds = array<i64: 32, 128>}]} {
    %c0 = arith.constant 0 : index
    %c0_0 = arith.constant 0 : index
    %0 = vector.load %arg1[%c0, %c0_0] : memref<32x128xbf16, #tpu.memory_space<vmem>>, vector<32x128xbf16>
    %c0_1 = arith.constant 0 : index
    %c0_2 = arith.constant 0 : index
    %1 = vector.load %arg2[%c0_1, %c0_2] : memref<128x128xbf16, #tpu.memory_space<vmem>>, vector<128x128xbf16>
    %cst = arith.constant dense<0.000000e+00> : vector<32x128xf32>
    %2 = tpu.matmul %0, %1, %cst {dimension_numbers = #tpu.dot_dimension_numbers<[1], [0], [0], [1], [0, 0, 1, 1], [], []>} : vector<32x128xbf16>, vector<128x128xbf16>, vector<32x128xf32> -> vector<32x128xf32>
    %c0_3 = arith.constant 0 : index
    %c0_4 = arith.constant 0 : index
    %3 = vector.load %arg3[%c0_3, %c0_4] : memref<1x128xf32, #tpu.memory_space<vmem>>, vector<1x128xf32>
    %4 = vector.broadcast %3 : vector<1x128xf32> to vector<32x128xf32>
    %5 = arith.addf %2, %4 : vector<32x128xf32>
    %6 = arith.truncf %5 : vector<32x128xf32> to vector<32x128xbf16>
    %c0_5 = arith.constant 0 : index
    %c0_6 = arith.constant 0 : index
    %7 = vector.load %arg4[%c0_5, %c0_6] : memref<128x128xbf16, #tpu.memory_space<vmem>>, vector<128x128xbf16>
    %cst_7 = arith.constant dense<0.000000e+00> : vector<32x128xf32>
    %8 = tpu.matmul %6, %7, %cst_7 {dimension_numbers = #tpu.dot_dimension_numbers<[1], [0], [0], [1], [0, 0, 1, 1], [], []>} : vector<32x128xbf16>, vector<128x128xbf16>, vector<32x128xf32> -> vector<32x128xf32>
    %9 = arith.truncf %8 : vector<32x128xf32> to vector<32x128xbf16>
    %c0_8 = arith.constant 0 : index
    %c0_9 = arith.constant 0 : index
    %10 = vector.load %arg5[%c0_8, %c0_9] : memref<32x128xbf16, #tpu.memory_space<vmem>>, vector<32x128xbf16>
    tpu.vector_store %arg5[%c0_8, %c0_9], %9 {strides = array<i32>} : memref<32x128xbf16, #tpu.memory_space<vmem>>, vector<32x128xbf16>,
    return
  }
  func.func @transform_0(%arg0: i32) -> (i32, i32) {
    %c0_i32 = arith.constant 0 : i32
    %c0_i32_0 = arith.constant 0 : i32
    return %arg0, %c0_i32 : i32, i32
  }
  func.func @transform_1(%arg0: i32) -> (i32, i32) {
    %c0_i32 = arith.constant 0 : i32
    %c0_i32_0 = arith.constant 0 : i32
    %c0_i32_1 = arith.constant 0 : i32
    return %c0_i32, %c0_i32_0 : i32, i32
  }
  func.func @transform_2(%arg0: i32) -> (i32, i32) {
    %c0_i32 = arith.constant 0 : i32
    %c0_i32_0 = arith.constant 0 : i32
    %c0_i32_1 = arith.constant 0 : i32
    return %c0_i32, %c0_i32_0 : i32, i32
  }
  func.func @transform_3(%arg0: i32) -> (i32, i32) {
    %c0_i32 = arith.constant 0 : i32
    %c0_i32_0 = arith.constant 0 : i32
    %c0_i32_1 = arith.constant 0 : i32
    return %c0_i32, %c0_i32_0 : i32, i32
  }
  func.func @transform_4(%arg0: i32) -> (i32, i32) {
    %c0_i32 = arith.constant 0 : i32
    %c0_i32_0 = arith.constant 0 : i32
    return %arg0, %c0_i32 : i32, i32
  }
}

module attributes {stable_mosaic.version = 11 : i64} {
  func.func @gconv_kernel(%arg0: i32, %arg1: i32, %arg2: memref<256x256xbf16, #tpu.memory_space<vmem>>, %arg3: memref<256x128xbf16, #tpu.memory_space<vmem>>, %arg4: memref<1x128xf32, #tpu.memory_space<vmem>>, %arg5: memref<256x128xf32, #tpu.memory_space<vmem>>) attributes {dimension_semantics = [#tpu.dimension_semantics<parallel>, #tpu.dimension_semantics<arbitrary>], iteration_bounds = array<i64: 1, 1>, scalar_prefetch = 0 : i64, scratch_operands = 0 : i64, tpu.core_type = #tpu.core_type<tc>, window_params = [{transform_indices = @transform_0, window_bounds = array<i64: 256, 256>}, {transform_indices = @transform_1, window_bounds = array<i64: 256, 128>}, {pipeline_mode = #tpu.pipeline_mode<synchronous>, transform_indices = @transform_2, window_bounds = array<i64: 1, 128>}, {transform_indices = @transform_3, window_bounds = array<i64: 256, 128>}]} {
    %c0_i32 = arith.constant 0 : i32
    %0 = arith.cmpi eq, %arg1, %c0_i32 : i32
    %1 = arith.extui %0 : i1 to i32
    %c0_i32_0 = arith.constant 0 : i32
    %2 = arith.cmpi ne, %1, %c0_i32_0 : i32
    scf.if %2 {
      %cst_10 = arith.constant 0.000000e+00 : f32
      %12 = vector.broadcast %cst_10 : f32 to vector<256x128xf32>
      %c0_11 = arith.constant 0 : index
      %c0_12 = arith.constant 0 : index
      %13 = vector.load %arg5[%c0_11, %c0_12] : memref<256x128xf32, #tpu.memory_space<vmem>>, vector<256x128xf32>
      tpu.vector_store %arg5[%c0_11, %c0_12], %12 {strides = array<i32>} : memref<256x128xf32, #tpu.memory_space<vmem>>, vector<256x128xf32>,
    } else {
    }
    %c0 = arith.constant 0 : index
    %c0_1 = arith.constant 0 : index
    %3 = vector.load %arg5[%c0, %c0_1] : memref<256x128xf32, #tpu.memory_space<vmem>>, vector<256x128xf32>
    %c0_2 = arith.constant 0 : index
    %c0_3 = arith.constant 0 : index
    %4 = vector.load %arg2[%c0_2, %c0_3] : memref<256x256xbf16, #tpu.memory_space<vmem>>, vector<256x256xbf16>
    %c0_4 = arith.constant 0 : index
    %c0_5 = arith.constant 0 : index
    %5 = vector.load %arg3[%c0_4, %c0_5] : memref<256x128xbf16, #tpu.memory_space<vmem>>, vector<256x128xbf16>
    %cst = arith.constant dense<0.000000e+00> : vector<256x128xf32>
    %6 = tpu.matmul %4, %5, %cst {dimension_numbers = #tpu.dot_dimension_numbers<[1], [0], [0], [1], [0, 0, 1, 1], [], []>} : vector<256x256xbf16>, vector<256x128xbf16>, vector<256x128xf32> -> vector<256x128xf32>
    %7 = arith.addf %3, %6 : vector<256x128xf32>
    %c0_6 = arith.constant 0 : index
    %c0_7 = arith.constant 0 : index
    %8 = vector.load %arg5[%c0_6, %c0_7] : memref<256x128xf32, #tpu.memory_space<vmem>>, vector<256x128xf32>
    tpu.vector_store %arg5[%c0_6, %c0_7], %7 {strides = array<i32>} : memref<256x128xf32, #tpu.memory_space<vmem>>, vector<256x128xf32>,
    %c0_i32_8 = arith.constant 0 : i32
    %9 = arith.cmpi eq, %arg1, %c0_i32_8 : i32
    %10 = arith.extui %9 : i1 to i32
    %c0_i32_9 = arith.constant 0 : i32
    %11 = arith.cmpi ne, %10, %c0_i32_9 : i32
    scf.if %11 {
      %c0_10 = arith.constant 0 : index
      %c0_11 = arith.constant 0 : index
      %12 = vector.load %arg5[%c0_10, %c0_11] : memref<256x128xf32, #tpu.memory_space<vmem>>, vector<256x128xf32>
      %c0_12 = arith.constant 0 : index
      %c0_13 = arith.constant 0 : index
      %13 = vector.load %arg4[%c0_12, %c0_13] : memref<1x128xf32, #tpu.memory_space<vmem>>, vector<1x128xf32>
      %14 = vector.broadcast %13 : vector<1x128xf32> to vector<256x128xf32>
      %15 = arith.addf %12, %14 : vector<256x128xf32>
      %cst_14 = arith.constant 0.000000e+00 : f32
      %16 = vector.broadcast %cst_14 : f32 to vector<256x128xf32>
      %17 = arith.maximumf %15, %16 : vector<256x128xf32>
      %c0_15 = arith.constant 0 : index
      %c0_16 = arith.constant 0 : index
      %18 = vector.load %arg5[%c0_15, %c0_16] : memref<256x128xf32, #tpu.memory_space<vmem>>, vector<256x128xf32>
      tpu.vector_store %arg5[%c0_15, %c0_16], %17 {strides = array<i32>} : memref<256x128xf32, #tpu.memory_space<vmem>>, vector<256x128xf32>,
    } else {
    }
    return
  }
  func.func @transform_0(%arg0: i32, %arg1: i32) -> (i32, i32) {
    %c0_i32 = arith.constant 0 : i32
    return %arg0, %arg1 : i32, i32
  }
  func.func @transform_1(%arg0: i32, %arg1: i32) -> (i32, i32) {
    %c0_i32 = arith.constant 0 : i32
    %c0_i32_0 = arith.constant 0 : i32
    return %arg1, %c0_i32 : i32, i32
  }
  func.func @transform_2(%arg0: i32, %arg1: i32) -> (i32, i32) {
    %c0_i32 = arith.constant 0 : i32
    %c0_i32_0 = arith.constant 0 : i32
    %c0_i32_1 = arith.constant 0 : i32
    return %c0_i32, %c0_i32_0 : i32, i32
  }
  func.func @transform_3(%arg0: i32, %arg1: i32) -> (i32, i32) {
    %c0_i32 = arith.constant 0 : i32
    %c0_i32_0 = arith.constant 0 : i32
    return %arg0, %c0_i32 : i32, i32
  }
}

</mosaic_0001>

<bundles_post_ra>
// kernel: gcn_forward.3
= control target key start
LH: loop header
LB: loop body
LE: loop exit
PB: predicated region body
PF: predicated region fallthrough
CT: control target
= control target key end

     0   :  { %s497_s1 = inlined_call_operand.vmem [shape: bf16[128,128], index: 1, kind: input, shape index: {}]   ;;  %s498_s0 = inlined_call_operand.vmem [shape: bf16[32,128], index: 0, kind: input, shape index: {}]   ;;  %s499_s3 = inlined_call_operand.vmem [shape: bf16[128,128], index: 3, kind: input, shape index: {}]   ;;  %s500_s2 = inlined_call_operand.vmem [shape: f32[1,128], index: 2, kind: input, shape index: {}]   ;;  %s501_s4 = inlined_call_operand.vmem [shape: bf16[32,128], index: 4, kind: output, shape index: {}]  }
   0x1   :  { %v391_v0 = vld [vmem:[%s497_s1] sm:$0xff]   ;;  %v392_v1 = vld [vmem:[%s497_s1 + $0x8] sm:$0xff]   ;;  %v393_v2 = vld [vmem:[%s497_s1 + $0x10] sm:$0xff]  }
   0x2   :  { %351 = vmatprep.subr.bf16.mxu0 %v391_v0  ;;  %v394_v3 = vld [vmem:[%s497_s1 + $0x18] sm:$0xff]   ;;  %v399_v4 = vld [vmem:[%s498_s0] sm:$0xff]   ;;  %v402_v6 = vld [vmem:[%s499_s3 + $0x8] sm:$0xff]  }
   0x3   :  { %352 = vmatpush3.bf16.msra.mxu0 %v391_v0  ;;  %367 = vmatprep.mubr.bf16.mxu0 %v399_v4  ;;  %v401_v5 = vld [vmem:[%s499_s3] sm:$0xff]   ;;  %v403_v8 = vld [vmem:[%s499_s3 + $0x10] sm:$0xff]   ;;  %v396_v9 = vld [vmem:[%s497_s1 + $0x28] sm:$0xff]  }
   0x4   :  { %353 = vmatprep.subr.bf16.mxu0 %v392_v1  ;;  %v395_v7 = vld [vmem:[%s497_s1 + $0x20] sm:$0xff]   ;;  %371 = vmatprep.subr.bf16.mxu1 %v401_v5  ;;  %v404_v10 = vld [vmem:[%s499_s3 + $0x18] sm:$0xff]   ;;  %v397_v11 = vld [vmem:[%s497_s1 + $0x30] sm:$0xff]  }
   0x5   :  { %372 = vmatpush3.bf16.msra.mxu1 %v401_v5  ;;  %v405_v12 = vld [vmem:[%s499_s3 + $0x20] sm:$0xff]   ;;  %v398_v13 = vld [vmem:[%s497_s1 + $0x38] sm:$0xff]   ;;  %v406_v14 = vld [vmem:[%s499_s3 + $0x28] sm:$0xff]  }
   0x6   :  { %373 = vmatprep.subr.bf16.mxu1 %v402_v6  ;;  %v400_v15 = vld [vmem:[%s498_s0 + $0x8] sm:$0xff]   ;;  %v407_v16 = vld [vmem:[%s499_s3 + $0x30] sm:$0xff]   ;;  %v408_v17 = vld [vmem:[%s499_s3 + $0x38] sm:$0xff]  }
   0x7   :  { %354 = vmatpush3.bf16.msra.mxu0 %v392_v1  ;;  %v293_v19 = vld [vmem:[%s500_s2] ss:$0 sm:$0xff] }
   0x8   :  { %355 = vmatprep.subr.bf16.mxu0 %v393_v2 }
   0x9   :  { %374 = vmatpush3.bf16.msra.mxu1 %v402_v6 }
   0xa   :  { %375 = vmatprep.subr.bf16.mxu1 %v403_v8 }
   0xb   :  { %356 = vmatpush3.bf16.msra.mxu0 %v393_v2 }
   0xc   :  { %357 = vmatprep.subr.bf16.mxu0 %v394_v3 }
   0xd   :  { %376 = vmatpush3.bf16.msra.mxu1 %v403_v8 }
   0xe   :  { %377 = vmatprep.subr.bf16.mxu1 %v404_v10 }
   0xf   :  { %358 = vmatpush3.bf16.msra.mxu0 %v394_v3 }
  0x10   :  { %359 = vmatprep.subr.bf16.mxu0 %v395_v7 }
  0x11   :  { %378 = vmatpush3.bf16.msra.mxu1 %v404_v10 }
  0x12   :  { %379 = vmatprep.subr.bf16.mxu1 %v405_v12 }
  0x13   :  { %360 = vmatpush3.bf16.msra.mxu0 %v395_v7 }
  0x14   :  { %361 = vmatprep.subr.bf16.mxu0 %v396_v9 }
  0x15   :  { %380 = vmatpush3.bf16.msra.mxu1 %v405_v12 }
  0x16   :  { %381 = vmatprep.subr.bf16.mxu1 %v406_v14 }
  0x17   :  { %362 = vmatpush3.bf16.msra.mxu0 %v396_v9 }
  0x18   :  { %363 = vmatprep.subr.bf16.mxu0 %v397_v11 }
  0x19   :  { %382 = vmatpush3.bf16.msra.mxu1 %v406_v14 }
  0x1a   :  { %383 = vmatprep.subr.bf16.mxu1 %v407_v16 }
  0x1b   :  { %364 = vmatpush3.bf16.msra.mxu0 %v397_v11 }
  0x1c   :  { %365 = vmatprep.subr.bf16.mxu0 %v398_v13 }
  0x1d   :  { %384 = vmatpush3.bf16.msra.mxu1 %v407_v16 }
  0x1e   :  { %385 = vmatprep.subr.bf16.mxu1 %v408_v17 }
  0x1f   :  { %366 = vmatpush3.bf16.msra.mxu0 %v398_v13 }
  0x21   :  { %386 = vmatpush3.bf16.msra.mxu1 %v408_v17 }
  0x22   :  { %368 = vmatmul.mubr.bf16.vlgmr.msra.gmra.mrb[0].mxu0 %v400_v15 }
  0xf5   :  { %v369_v18 = vpop.f32.mrb[0].mxu0 }
  0xf6   :  { %v139_v20 = vpop.f32.mrb[1].mxu0  ;;  %v148_v22 = vadd.f32 %v369_v18, %v293_v19 }
  0xf7   :  { %v370_v21 = vpop.f32.mrb[2].mxu0  ;;  %v140_v25 = vadd.f32 %v293_v19, %v139_v20 }
  0xf8   :  { %v151_v23 = vadd.f32 %v370_v21, %v293_v19  ;;  %v142_v24 = vpop.f32.mrb[3].mxu0 }
  0xf9   :  { %v143_v26 = vadd.f32 %v293_v19, %v142_v24 }
  0xfa   :  { %v155_v27 = vpack.c.bf16 %v151_v23, %v148_v22 }
  0xfb   :  { %v154_v28 = vpack.c.bf16 %v143_v26, %v140_v25 }
  0xfd   :  { %387 = vmatprep.mubr.bf16.mxu1 %v154_v28 }
  0xfe   :  { %388 = vmatmul.mubr.bf16.vlgmr.msra.gmra.mrb[0].mxu1 %v155_v27 }
 0x1d1   :  { %v389_v29 = vpop.f32.mrb[0].mxu1 }
 0x1d2   :  { %v254_v30 = vpop.f32.mrb[1].mxu1 }
 0x1d3   :  { %v390_v31 = vpop.f32.mrb[2].mxu1 }
 0x1d4   :  { %v328_v32 = vpack.c.bf16 %v390_v31, %v389_v29  ;;  %v257_v33 = vpop.f32.mrb[3].mxu1 }
 0x1d5   :  { %v323_v34 = vpack.c.bf16 %v257_v33, %v254_v30 }
 0x1d6   :  { %330 = vst [vmem:[%s501_s4 + $0x8] sm:$0xff] %v328_v32  }
 0x1d7   :  { %324 = vst [vmem:[%s501_s4] sm:$0xff] %v323_v34  }

// kernel: gcn_forward.4
= control target key start
LH: loop header
LB: loop body
LE: loop exit
PB: predicated region body
PF: predicated region fallthrough
CT: control target
= control target key end

     0   :  { %v362_v0 = vmov 0.0   ;;  %vm363_vm0 = vmmov 0   ;;  %s446_s1 = inlined_call_operand.vmem [shape: bf16[128,128], index: 1, kind: input, shape index: {}]   ;;  %s447_s3 = inlined_call_operand.vmem [shape: bf16[128,128], index: 3, kind: input, shape index: {}]   ;;  %s448_s0 = inlined_call_operand.vmem [shape: bf16[16,128], index: 0, kind: input, shape index: {}]   ;;  %s449_s2 = inlined_call_operand.vmem [shape: f32[1,128], index: 2, kind: input, shape index: {}]   ;;  %s450_s4 = inlined_call_operand.vmem [shape: bf16[16,128], index: 4, kind: output, shape index: {}]  }
   0x1   :  { %303 = vmatprep.subr.bf16.mxu0 %v362_v0  ;;  %v345_v1 = vld [vmem:[%s446_s1] sm:$0xff]   ;;  %319 = vmatprep.mubr.msk.bf16.mxu0 %vm363_vm0, %v362_v0  ;;  %v346_v2 = vld [vmem:[%s446_s1 + $0x8] sm:$0xff]   ;;  %v347_v3 = vld [vmem:[%s446_s1 + $0x10] sm:$0xff]  }
   0x2   :  { %323 = vmatprep.subr.bf16.mxu1 %v362_v0  ;;  %339 = vmatprep.mubr.msk.bf16.mxu1 %vm363_vm0, %v362_v0  ;;  %v354_v4 = vld [vmem:[%s447_s3] sm:$0xff]   ;;  %v348_v5 = vld [vmem:[%s446_s1 + $0x18] sm:$0xff]   ;;  %v355_v6 = vld [vmem:[%s447_s3 + $0x8] sm:$0xff]  }
   0x3   :  { %304 = vmatpush3.bf16.msra.mxu0 %v345_v1  ;;  %324 = vmatpush3.bf16.msra.mxu1 %v354_v4  ;;  %v349_v7 = vld [vmem:[%s446_s1 + $0x20] sm:$0xff]   ;;  %v356_v8 = vld [vmem:[%s447_s3 + $0x10] sm:$0xff]   ;;  %v350_v9 = vld [vmem:[%s446_s1 + $0x28] sm:$0xff]  }
   0x4   :  { %305 = vmatprep.subr.bf16.mxu0 %v362_v0  ;;  %325 = vmatprep.subr.bf16.mxu1 %v362_v0  ;;  %v357_v10 = vld [vmem:[%s447_s3 + $0x18] sm:$0xff]   ;;  %v351_v11 = vld [vmem:[%s446_s1 + $0x30] sm:$0xff]   ;;  %v358_v12 = vld [vmem:[%s447_s3 + $0x20] sm:$0xff]  }
   0x5   :  { %v352_v13 = vld [vmem:[%s446_s1 + $0x38] sm:$0xff]   ;;  %v359_v14 = vld [vmem:[%s447_s3 + $0x28] sm:$0xff]   ;;  %v353_v15 = vld [vmem:[%s448_s0] sm:$0xff]  }
   0x6   :  { %v360_v16 = vld [vmem:[%s447_s3 + $0x30] sm:$0xff]   ;;  %v361_v17 = vld [vmem:[%s447_s3 + $0x38] sm:$0xff]   ;;  %v258_v18 = vld [vmem:[%s449_s2] ss:$0 sm:$0xff] }
   0x7   :  { %306 = vmatpush3.bf16.msra.mxu0 %v346_v2  ;;  %326 = vmatpush3.bf16.msra.mxu1 %v355_v6 }
   0x8   :  { %307 = vmatprep.subr.bf16.mxu0 %v362_v0  ;;  %327 = vmatprep.subr.bf16.mxu1 %v362_v0 }
   0xb   :  { %308 = vmatpush3.bf16.msra.mxu0 %v347_v3  ;;  %328 = vmatpush3.bf16.msra.mxu1 %v356_v8 }
   0xc   :  { %309 = vmatprep.subr.bf16.mxu0 %v362_v0  ;;  %329 = vmatprep.subr.bf16.mxu1 %v362_v0 }
   0xf   :  { %310 = vmatpush3.bf16.msra.mxu0 %v348_v5  ;;  %330 = vmatpush3.bf16.msra.mxu1 %v357_v10 }
  0x10   :  { %311 = vmatprep.subr.bf16.mxu0 %v362_v0  ;;  %331 = vmatprep.subr.bf16.mxu1 %v362_v0 }
  0x13   :  { %312 = vmatpush3.bf16.msra.mxu0 %v349_v7  ;;  %332 = vmatpush3.bf16.msra.mxu1 %v358_v12 }
  0x14   :  { %313 = vmatprep.subr.bf16.mxu0 %v362_v0  ;;  %333 = vmatprep.subr.bf16.mxu1 %v362_v0 }
  0x17   :  { %314 = vmatpush3.bf16.msra.mxu0 %v350_v9  ;;  %334 = vmatpush3.bf16.msra.mxu1 %v359_v14 }
  0x18   :  { %315 = vmatprep.subr.bf16.mxu0 %v362_v0  ;;  %335 = vmatprep.subr.bf16.mxu1 %v362_v0 }
  0x1b   :  { %316 = vmatpush3.bf16.msra.mxu0 %v351_v11  ;;  %336 = vmatpush3.bf16.msra.mxu1 %v360_v16 }
  0x1c   :  { %317 = vmatprep.subr.bf16.mxu0 %v362_v0  ;;  %337 = vmatprep.subr.bf16.mxu1 %v362_v0 }
  0x1f   :  { %318 = vmatpush3.bf16.msra.mxu0 %v352_v13  ;;  %338 = vmatpush3.bf16.msra.mxu1 %v361_v17 }
  0x22   :  { %320 = vmatmul.mubr.bf16.vlgmr.msra.gmra.mrb[0].mxu0 %v353_v15 }
  0xf5   :  { %v131_v19 = vpop.f32.mrb[0].mxu0 }
  0xf6   :  { %v321_v20 = vpop.f32.mrb[1].mxu0  ;;  %v132_v22 = vadd.f32 %v258_v18, %v131_v19 }
  0xf7   :  { %v134_v21 = vpop.f32.mrb[2].mxu0 }
  0xf8   :  { %v135_v23 = vadd.f32 %v258_v18, %v134_v21  ;;  %v322_v24 = vpop.f32.mrb[3].mxu0 }
  0xfa   :  { %v138_v25 = vpack.c.bf16 %v135_v23, %v132_v22 }
  0xfc   :  { %340 = vmatmul.mubr.bf16.vlgmr.msra.gmra.mrb[0].mxu1 %v138_v25 }
 0x1cf   :  { %v237_v26 = vpop.f32.mrb[0].mxu1 }
 0x1d0   :  { %v341_v27 = vpop.f32.mrb[1].mxu1 }
 0x1d1   :  { %v240_v28 = vpop.f32.mrb[2].mxu1 }
 0x1d2   :  { %v283_v29 = vpack.c.bf16 %v240_v28, %v237_v26  ;;  %v342_v30 = vpop.f32.mrb[3].mxu1 }
 0x1d4   :  { %284 = vst [vmem:[%s450_s4] sm:$0xff] %v283_v29  }

// kernel: gcn_forward.5
= control target key start
LH: loop header
LB: loop body
LE: loop exit
PB: predicated region body
PF: predicated region fallthrough
CT: control target
= control target key end

     0   :  { %s1309_s1 = inlined_call_operand.vmem [shape: bf16[256,128], index: 1, kind: input, shape index: {}]   ;;  %s1310_s0 = inlined_call_operand.vmem [shape: bf16[256,256], index: 0, kind: input, shape index: {}]   ;;  %s1311_s2 = inlined_call_operand.vmem [shape: f32[1,128], index: 2, kind: input, shape index: {}]   ;;  %s1312_s3 = inlined_call_operand.vmem [shape: f32[256,128], index: 3, kind: output, shape index: {}]  }
   0x1   :  { %v948_v0 = vld [vmem:[%s1309_s1 + $0x40] sm:$0xff]   ;;  %v950_v2 = vld [vmem:[%s1309_s1 + $0x48] sm:$0xff]   ;;  %v952_v4 = vld [vmem:[%s1309_s1 + $0x50] sm:$0xff]  }
   0x2   :  { %v949_v1 = vld [vmem:[%s1309_s1] sm:$0xff]   ;;  %819 = vmatprep.subr.bf16.mxu0 %v948_v0  ;;  %931 = vmatprep.subr.bf16.mxu1 %v948_v0  ;;  %v951_v3 = vld [vmem:[%s1309_s1 + $0x8] sm:$0xff]   ;;  %v953_v5 = vld [vmem:[%s1309_s1 + $0x10] sm:$0xff]  }
   0x3   :  { %820 = vmatpush3.bf16.msra.mxu0 %v949_v1  ;;  %939 = vmatpush3.bf16.msra.mxu1 %v949_v1  ;;  %v954_v6 = vld [vmem:[%s1309_s1 + $0x58] sm:$0xff]   ;;  %v956_v8 = vld [vmem:[%s1309_s1 + $0x60] sm:$0xff]   ;;  %v958_v10 = vld [vmem:[%s1309_s1 + $0x68] sm:$0xff]  }
   0x4   :  { %821 = vmatprep.subr.bf16.mxu0 %v950_v2  ;;  %932 = vmatprep.subr.bf16.mxu1 %v950_v2  ;;  %v955_v7 = vld [vmem:[%s1309_s1 + $0x18] sm:$0xff]   ;;  %v957_v9 = vld [vmem:[%s1309_s1 + $0x20] sm:$0xff]   ;;  %v959_v13 = vld [vmem:[%s1309_s1 + $0x28] sm:$0xff]  }
   0x5   :  { %v966_v11 = vld [vmem:[%s1310_s0 + $0x4] ss:$8 sps:$4 sm:$0xff]   ;;  %v960_v14 = vld [vmem:[%s1309_s1 + $0x70] sm:$0xff]   ;;  %v962_v16 = vld [vmem:[%s1309_s1 + $0x78] sm:$0xff]  }
   0x6   :  { %v969_v12 = vld [vmem:[%s1310_s0 + $0x84] ss:$8 sps:$4 sm:$0xff]   ;;  %435 = vmatprep.mubr.bf16.mxu0 %v966_v11  ;;  %v961_v15 = vld [vmem:[%s1309_s1 + $0x30] sm:$0xff]   ;;  %v963_v17 = vld [vmem:[%s1309_s1 + $0x38] sm:$0xff]  }
   0x7   :  { %822 = vmatpush3.bf16.msra.mxu0 %v951_v3  ;;  %940 = vmatpush3.bf16.msra.mxu1 %v951_v3  ;;  %v964_v18 = vld [vmem:[%s1310_s0] ss:$8 sps:$4 sm:$0xff]   ;;  %v970_v20 = vld [vmem:[%s1310_s0 + $0x14] ss:$8 sps:$4 sm:$0xff]   ;;  %v974_v22 = vld [vmem:[%s1310_s0 + $0x10] ss:$8 sps:$4 sm:$0xff]  }
   0x8   :  { %823 = vmatprep.subr.bf16.mxu0 %v952_v4  ;;  %933 = vmatprep.subr.bf16.mxu1 %v952_v4  ;;  %v967_v19 = vld [vmem:[%s1310_s0 + $0x80] ss:$8 sps:$4 sm:$0xff]   ;;  %v972_v21 = vld [vmem:[%s1310_s0 + $0x94] ss:$8 sps:$4 sm:$0xff]   ;;  %v975_v23 = vld [vmem:[%s1310_s0 + $0x90] ss:$8 sps:$4 sm:$0xff]  }
   0x9   :  { %499 = vmatprep.mubr.bf16.mxu1 %v969_v12  ;;  %v976_v24 = vld [vmem:[%s1310_s0 + $0x24] ss:$8 sps:$4 sm:$0xff]   ;;  %v980_v26 = vld [vmem:[%s1310_s0 + $0x20] ss:$8 sps:$4 sm:$0xff]   ;;  %v982_v28 = vld [vmem:[%s1310_s0 + $0x34] ss:$8 sps:$4 sm:$0xff]  }
   0xa   :  { %v978_v25 = vld [vmem:[%s1310_s0 + $0xa4] ss:$8 sps:$4 sm:$0xff]   ;;  %v981_v27 = vld [vmem:[%s1310_s0 + $0xa0] ss:$8 sps:$4 sm:$0xff]   ;;  %v984_v29 = vld [vmem:[%s1310_s0 + $0xb4] ss:$8 sps:$4 sm:$0xff]  }
   0xb   :  { %824 = vmatpush3.bf16.msra.mxu0 %v953_v5  ;;  %941 = vmatpush3.bf16.msra.mxu1 %v953_v5  ;;  %v986_v30 = vld [vmem:[%s1310_s0 + $0x30] ss:$8 sps:$4 sm:$0xff]   ;;  %v988_v32 = vld [vmem:[%s1310_s0 + $0x44] ss:$8 sps:$4 sm:$0xff]   ;;  %v992_v34 = vld [vmem:[%s1310_s0 + $0x40] ss:$8 sps:$4 sm:$0xff]  }
   0xc   :  { %825 = vmatprep.subr.bf16.mxu0 %v954_v6  ;;  %934 = vmatprep.subr.bf16.mxu1 %v954_v6  ;;  %v987_v31 = vld [vmem:[%s1310_s0 + $0xb0] ss:$8 sps:$4 sm:$0xff]   ;;  %v990_v33 = vld [vmem:[%s1310_s0 + $0xc4] ss:$8 sps:$4 sm:$0xff]   ;;  %v993_v35 = vld [vmem:[%s1310_s0 + $0xc0] ss:$8 sps:$4 sm:$0xff]  }
   0xd   :  { %v994_v36 = vld [vmem:[%s1310_s0 + $0x54] ss:$8 sps:$4 sm:$0xff]   ;;  %v998_v38 = vld [vmem:[%s1310_s0 + $0x50] ss:$8 sps:$4 sm:$0xff]   ;;  %v1000_v40 = vld [vmem:[%s1310_s0 + $0x64] ss:$8 sps:$4 sm:$0xff]  }
   0xe   :  { %v996_v37 = vld [vmem:[%s1310_s0 + $0xd4] ss:$8 sps:$4 sm:$0xff]   ;;  %v999_v39 = vld [vmem:[%s1310_s0 + $0xd0] ss:$8 sps:$4 sm:$0xff]   ;;  %v1002_v41 = vld [vmem:[%s1310_s0 + $0xe4] ss:$8 sps:$4 sm:$0xff]  }
   0xf   :  { %826 = vmatpush3.bf16.msra.mxu0 %v955_v7  ;;  %942 = vmatpush3.bf16.msra.mxu1 %v955_v7  ;;  %v1004_v42 = vld [vmem:[%s1310_s0 + $0x60] ss:$8 sps:$4 sm:$0xff]   ;;  %v1006_v44 = vld [vmem:[%s1310_s0 + $0x74] ss:$8 sps:$4 sm:$0xff]   ;;  %v1010_v46 = vld [vmem:[%s1310_s0 + $0x70] ss:$8 sps:$4 sm:$0xff]  }
  0x10   :  { %827 = vmatprep.subr.bf16.mxu0 %v956_v8  ;;  %935 = vmatprep.subr.bf16.mxu1 %v956_v8  ;;  %v1005_v43 = vld [vmem:[%s1310_s0 + $0xe0] ss:$8 sps:$4 sm:$0xff]   ;;  %v1008_v45 = vld [vmem:[%s1310_s0 + $0xf4] ss:$8 sps:$4 sm:$0xff]   ;;  %v1011_v47 = vld [vmem:[%s1310_s0 + $0xf0] ss:$8 sps:$4 sm:$0xff]  }
  0x11   :  { %v1179_v56 = vld [vmem:[%s1311_s2] ss:$0 sm:$0xff] }
  0x13   :  { %828 = vmatpush3.bf16.msra.mxu0 %v957_v9  ;;  %943 = vmatpush3.bf16.msra.mxu1 %v957_v9 }
  0x14   :  { %829 = vmatprep.subr.bf16.mxu0 %v958_v10  ;;  %936 = vmatprep.subr.bf16.mxu1 %v958_v10 }
  0x17   :  { %830 = vmatpush3.bf16.msra.mxu0 %v959_v13  ;;  %944 = vmatpush3.bf16.msra.mxu1 %v959_v13 }
  0x18   :  { %831 = vmatprep.subr.bf16.mxu0 %v960_v14  ;;  %937 = vmatprep.subr.bf16.mxu1 %v960_v14 }
  0x1b   :  { %832 = vmatpush3.bf16.msra.mxu0 %v961_v15  ;;  %945 = vmatpush3.bf16.msra.mxu1 %v961_v15 }
  0x1c   :  { %833 = vmatprep.subr.bf16.mxu0 %v962_v16  ;;  %938 = vmatprep.subr.bf16.mxu1 %v962_v16 }
  0x1f   :  { %834 = vmatpush3.bf16.msra.mxu0 %v963_v17  ;;  %946 = vmatpush3.bf16.msra.mxu1 %v963_v17 }
  0x22   :  { %436 = vmatmul.mubr.bf16.vlgmr.msra.gmra.mrb[0].mxu0 %v964_v18  ;;  %500 = vmatmul.mubr.bf16.vlgmr.msra.gmra.mrb[0].mxu1 %v967_v19 }
  0x23   :  { %443 = vmatprep.mubr.bf16.mxu0 %v970_v20  ;;  %507 = vmatprep.mubr.bf16.mxu1 %v972_v21 }
  0x2a   :  { %444 = vmatmul.mubr.bf16.gmra.mrb[4].mxu0 %v974_v22  ;;  %508 = vmatmul.mubr.bf16.gmra.mrb[4].mxu1 %v975_v23 }
  0x2b   :  { %451 = vmatprep.mubr.bf16.mxu0 %v976_v24  ;;  %515 = vmatprep.mubr.bf16.mxu1 %v978_v25 }
  0x32   :  { %452 = vmatmul.mubr.bf16.gmra.mrb[8].mxu0 %v980_v26  ;;  %516 = vmatmul.mubr.bf16.gmra.mrb[8].mxu1 %v981_v27 }
  0x33   :  { %459 = vmatprep.mubr.bf16.mxu0 %v982_v28  ;;  %523 = vmatprep.mubr.bf16.mxu1 %v984_v29 }
  0x3a   :  { %460 = vmatmul.mubr.bf16.gmra.mrb[12].mxu0 %v986_v30  ;;  %524 = vmatmul.mubr.bf16.gmra.mrb[12].mxu1 %v987_v31 }
  0x3b   :  { %467 = vmatprep.mubr.bf16.mxu0 %v988_v32  ;;  %531 = vmatprep.mubr.bf16.mxu1 %v990_v33 }
  0x42   :  { %468 = vmatmul.mubr.bf16.gmra.mrb[16].mxu0 %v992_v34  ;;  %532 = vmatmul.mubr.bf16.gmra.mrb[16].mxu1 %v993_v35 }
  0x43   :  { %475 = vmatprep.mubr.bf16.mxu0 %v994_v36  ;;  %539 = vmatprep.mubr.bf16.mxu1 %v996_v37 }
  0x4a   :  { %476 = vmatmul.mubr.bf16.gmra.mrb[20].mxu0 %v998_v38  ;;  %540 = vmatmul.mubr.bf16.gmra.mrb[20].mxu1 %v999_v39 }
  0x4b   :  { %483 = vmatprep.mubr.bf16.mxu0 %v1000_v40  ;;  %547 = vmatprep.mubr.bf16.mxu1 %v1002_v41 }
  0x52   :  { %484 = vmatmul.mubr.bf16.gmra.mrb[24].mxu0 %v1004_v42  ;;  %548 = vmatmul.mubr.bf16.gmra.mrb[24].mxu1 %v1005_v43 }
  0x53   :  { %491 = vmatprep.mubr.bf16.mxu0 %v1006_v44  ;;  %555 = vmatprep.mubr.bf16.mxu1 %v1008_v45 }
  0x5a   :  { %492 = vmatmul.mubr.bf16.gmra.mrb[28].mxu0 %v1010_v46  ;;  %556 = vmatmul.mubr.bf16.gmra.mrb[28].mxu1 %v1011_v47 }
  0xf5   :  { %v835_v48 = vpop.f32.mrb[0].mxu0  ;;  %v883_v49 = vpop.f32.mrb[0].mxu1 }
  0xf6   :  { %v836_v50 = vpop.f32.mrb[1].mxu0  ;;  %v884_v51 = vpop.f32.mrb[1].mxu1 }
  0xf7   :  { %v837_v52 = vadd.f32 %v836_v50, %v835_v48  ;;  %v885_v53 = vadd.f32 %v884_v51, %v883_v49  ;;  %v838_v54 = vpop.f32.mrb[2].mxu0  ;;  %v886_v55 = vpop.f32.mrb[2].mxu1 }
  0xf8   :  { %v839_v57 = vpop.f32.mrb[3].mxu0  ;;  %v887_v58 = vpop.f32.mrb[3].mxu1 }
  0xf9   :  { %v840_v59 = vadd.f32 %v839_v57, %v838_v54  ;;  %v888_v60 = vadd.f32 %v887_v58, %v886_v55  ;;  %v670_v61 = vadd.f32 %v837_v52, %v1179_v56  ;;  %v686_v62 = vadd.f32 %v885_v53, %v1179_v56 }
  0xfb   :  { %v702_v63 = vmax.f32 %v670_v61, 0.0  ;;  %v718_v0 = vmax.f32 %v686_v62, 0.0  ;;  %v671_v1 = vadd.f32 %v840_v59, %v1179_v56  ;;  %v687_v2 = vadd.f32 %v888_v60, %v1179_v56 }
  0xfd   :  { %v841_v3 = vpop.f32.mrb[4].mxu0  ;;  %v889_v4 = vpop.f32.mrb[4].mxu1  ;;  %734 = vst [vmem:[%s1312_s3] sm:$0xff] %v702_v63  ;;  %750 = vst [vmem:[%s1312_s3 + $0x80] sm:$0xff] %v718_v0  ;;  %v703_v7 = vmax.f32 %v671_v1, 0.0  ;;  %v719_v8 = vmax.f32 %v687_v2, 0.0 }
  0xfe   :  { %v842_v5 = vpop.f32.mrb[5].mxu0  ;;  %v890_v6 = vpop.f32.mrb[5].mxu1 }
  0xff   :  { %v843_v9 = vadd.f32 %v842_v5, %v841_v3  ;;  %v891_v10 = vadd.f32 %v890_v6, %v889_v4  ;;  %v844_v11 = vpop.f32.mrb[6].mxu0  ;;  %v892_v12 = vpop.f32.mrb[6].mxu1  ;;  %735 = vst [vmem:[%s1312_s3 + $0x8] sm:$0xff] %v703_v7  ;;  %751 = vst [vmem:[%s1312_s3 + $0x88] sm:$0xff] %v719_v8 }
 0x100   :  { %v845_v13 = vpop.f32.mrb[7].mxu0  ;;  %v893_v14 = vpop.f32.mrb[7].mxu1 }
 0x101   :  { %v846_v15 = vadd.f32 %v845_v13, %v844_v11  ;;  %v894_v16 = vadd.f32 %v893_v14, %v892_v12  ;;  %v672_v17 = vadd.f32 %v843_v9, %v1179_v56  ;;  %v688_v18 = vadd.f32 %v891_v10, %v1179_v56 }
 0x103   :  { %v704_v19 = vmax.f32 %v672_v17, 0.0  ;;  %v720_v20 = vmax.f32 %v688_v18, 0.0  ;;  %v673_v21 = vadd.f32 %v846_v15, %v1179_v56  ;;  %v689_v22 = vadd.f32 %v894_v16, %v1179_v56 }
 0x105   :  { %v847_v23 = vpop.f32.mrb[8].mxu0  ;;  %v895_v24 = vpop.f32.mrb[8].mxu1  ;;  %736 = vst [vmem:[%s1312_s3 + $0x10] sm:$0xff] %v704_v19  ;;  %752 = vst [vmem:[%s1312_s3 + $0x90] sm:$0xff] %v720_v20  ;;  %v705_v27 = vmax.f32 %v673_v21, 0.0  ;;  %v721_v28 = vmax.f32 %v689_v22, 0.0 }
 0x106   :  { %v848_v25 = vpop.f32.mrb[9].mxu0  ;;  %v896_v26 = vpop.f32.mrb[9].mxu1 }
 0x107   :  { %v849_v29 = vadd.f32 %v848_v25, %v847_v23  ;;  %v897_v30 = vadd.f32 %v896_v26, %v895_v24  ;;  %v850_v31 = vpop.f32.mrb[10].mxu0  ;;  %v898_v32 = vpop.f32.mrb[10].mxu1  ;;  %737 = vst [vmem:[%s1312_s3 + $0x18] sm:$0xff] %v705_v27  ;;  %753 = vst [vmem:[%s1312_s3 + $0x98] sm:$0xff] %v721_v28 }
 0x108   :  { %v851_v33 = vpop.f32.mrb[11].mxu0  ;;  %v899_v34 = vpop.f32.mrb[11].mxu1 }
 0x109   :  { %v852_v35 = vadd.f32 %v851_v33, %v850_v31  ;;  %v900_v36 = vadd.f32 %v899_v34, %v898_v32  ;;  %v674_v37 = vadd.f32 %v849_v29, %v1179_v56  ;;  %v690_v38 = vadd.f32 %v897_v30, %v1179_v56 }
 0x10b   :  { %v706_v39 = vmax.f32 %v674_v37, 0.0  ;;  %v722_v40 = vmax.f32 %v690_v38, 0.0  ;;  %v675_v41 = vadd.f32 %v852_v35, %v1179_v56  ;;  %v691_v42 = vadd.f32 %v900_v36, %v1179_v56 }
 0x10d   :  { %v853_v43 = vpop.f32.mrb[12].mxu0  ;;  %v901_v44 = vpop.f32.mrb[12].mxu1  ;;  %738 = vst [vmem:[%s1312_s3 + $0x20] sm:$0xff] %v706_v39  ;;  %754 = vst [vmem:[%s1312_s3 + $0xa0] sm:$0xff] %v722_v40  ;;  %v707_v47 = vmax.f32 %v675_v41, 0.0  ;;  %v723_v48 = vmax.f32 %v691_v42, 0.0 }
 0x10e   :  { %v854_v45 = vpop.f32.mrb[13].mxu0  ;;  %v902_v46 = vpop.f32.mrb[13].mxu1 }
 0x10f   :  { %v855_v49 = vadd.f32 %v854_v45, %v853_v43  ;;  %v903_v50 = vadd.f32 %v902_v46, %v901_v44  ;;  %v856_v51 = vpop.f32.mrb[14].mxu0  ;;  %v904_v52 = vpop.f32.mrb[14].mxu1  ;;  %739 = vst [vmem:[%s1312_s3 + $0x28] sm:$0xff] %v707_v47  ;;  %755 = vst [vmem:[%s1312_s3 + $0xa8] sm:$0xff] %v723_v48 }
 0x110   :  { %v857_v53 = vpop.f32.mrb[15].mxu0  ;;  %v905_v54 = vpop.f32.mrb[15].mxu1 }
 0x111   :  { %v858_v55 = vadd.f32 %v857_v53, %v856_v51  ;;  %v906_v57 = vadd.f32 %v905_v54, %v904_v52  ;;  %v676_v58 = vadd.f32 %v855_v49, %v1179_v56  ;;  %v692_v59 = vadd.f32 %v903_v50, %v1179_v56 }
 0x113   :  { %v708_v60 = vmax.f32 %v676_v58, 0.0  ;;  %v724_v61 = vmax.f32 %v692_v59, 0.0  ;;  %v677_v62 = vadd.f32 %v858_v55, %v1179_v56  ;;  %v693_v63 = vadd.f32 %v906_v57, %v1179_v56 }
 0x115   :  { %v859_v0 = vpop.f32.mrb[16].mxu0  ;;  %v907_v1 = vpop.f32.mrb[16].mxu1  ;;  %740 = vst [vmem:[%s1312_s3 + $0x30] sm:$0xff] %v708_v60  ;;  %756 = vst [vmem:[%s1312_s3 + $0xb0] sm:$0xff] %v724_v61  ;;  %v709_v4 = vmax.f32 %v677_v62, 0.0  ;;  %v725_v5 = vmax.f32 %v693_v63, 0.0 }
 0x116   :  { %v860_v2 = vpop.f32.mrb[17].mxu0  ;;  %v908_v3 = vpop.f32.mrb[17].mxu1 }
 0x117   :  { %v861_v6 = vadd.f32 %v860_v2, %v859_v0  ;;  %v909_v7 = vadd.f32 %v908_v3, %v907_v1  ;;  %v862_v8 = vpop.f32.mrb[18].mxu0  ;;  %v910_v9 = vpop.f32.mrb[18].mxu1  ;;  %741 = vst [vmem:[%s1312_s3 + $0x38] sm:$0xff] %v709_v4  ;;  %757 = vst [vmem:[%s1312_s3 + $0xb8] sm:$0xff] %v725_v5 }
 0x118   :  { %v863_v10 = vpop.f32.mrb[19].mxu0  ;;  %v911_v11 = vpop.f32.mrb[19].mxu1 }
 0x119   :  { %v864_v12 = vadd.f32 %v863_v10, %v862_v8  ;;  %v912_v13 = vadd.f32 %v911_v11, %v910_v9  ;;  %v678_v14 = vadd.f32 %v861_v6, %v1179_v56  ;;  %v694_v15 = vadd.f32 %v909_v7, %v1179_v56 }
 0x11b   :  { %v710_v16 = vmax.f32 %v678_v14, 0.0  ;;  %v726_v17 = vmax.f32 %v694_v15, 0.0  ;;  %v679_v18 = vadd.f32 %v864_v12, %v1179_v56  ;;  %v695_v19 = vadd.f32 %v912_v13, %v1179_v56 }
 0x11d   :  { %v865_v20 = vpop.f32.mrb[20].mxu0  ;;  %v913_v21 = vpop.f32.mrb[20].mxu1  ;;  %742 = vst [vmem:[%s1312_s3 + $0x40] sm:$0xff] %v710_v16  ;;  %758 = vst [vmem:[%s1312_s3 + $0xc0] sm:$0xff] %v726_v17  ;;  %v711_v24 = vmax.f32 %v679_v18, 0.0  ;;  %v727_v25 = vmax.f32 %v695_v19, 0.0 }
 0x11e   :  { %v866_v22 = vpop.f32.mrb[21].mxu0  ;;  %v914_v23 = vpop.f32.mrb[21].mxu1 }
 0x11f   :  { %v867_v26 = vadd.f32 %v866_v22, %v865_v20  ;;  %v915_v27 = vadd.f32 %v914_v23, %v913_v21  ;;  %v868_v28 = vpop.f32.mrb[22].mxu0  ;;  %v916_v29 = vpop.f32.mrb[22].mxu1  ;;  %743 = vst [vmem:[%s1312_s3 + $0x48] sm:$0xff] %v711_v24  ;;  %759 = vst [vmem:[%s1312_s3 + $0xc8] sm:$0xff] %v727_v25 }
 0x120   :  { %v869_v30 = vpop.f32.mrb[23].mxu0  ;;  %v917_v31 = vpop.f32.mrb[23].mxu1 }
 0x121   :  { %v870_v32 = vadd.f32 %v869_v30, %v868_v28  ;;  %v918_v33 = vadd.f32 %v917_v31, %v916_v29  ;;  %v680_v34 = vadd.f32 %v867_v26, %v1179_v56  ;;  %v696_v35 = vadd.f32 %v915_v27, %v1179_v56 }
 0x123   :  { %v712_v36 = vmax.f32 %v680_v34, 0.0  ;;  %v728_v37 = vmax.f32 %v696_v35, 0.0  ;;  %v681_v38 = vadd.f32 %v870_v32, %v1179_v56  ;;  %v697_v39 = vadd.f32 %v918_v33, %v1179_v56 }
 0x125   :  { %v871_v40 = vpop.f32.mrb[24].mxu0  ;;  %v919_v41 = vpop.f32.mrb[24].mxu1  ;;  %744 = vst [vmem:[%s1312_s3 + $0x50] sm:$0xff] %v712_v36  ;;  %760 = vst [vmem:[%s1312_s3 + $0xd0] sm:$0xff] %v728_v37  ;;  %v713_v44 = vmax.f32 %v681_v38, 0.0  ;;  %v729_v45 = vmax.f32 %v697_v39, 0.0 }
 0x126   :  { %v872_v42 = vpop.f32.mrb[25].mxu0  ;;  %v920_v43 = vpop.f32.mrb[25].mxu1 }
 0x127   :  { %v873_v46 = vadd.f32 %v872_v42, %v871_v40  ;;  %v921_v47 = vadd.f32 %v920_v43, %v919_v41  ;;  %v874_v48 = vpop.f32.mrb[26].mxu0  ;;  %v922_v49 = vpop.f32.mrb[26].mxu1  ;;  %745 = vst [vmem:[%s1312_s3 + $0x58] sm:$0xff] %v713_v44  ;;  %761 = vst [vmem:[%s1312_s3 + $0xd8] sm:$0xff] %v729_v45 }
 0x128   :  { %v875_v50 = vpop.f32.mrb[27].mxu0  ;;  %v923_v51 = vpop.f32.mrb[27].mxu1 }
 0x129   :  { %v876_v52 = vadd.f32 %v875_v50, %v874_v48  ;;  %v924_v53 = vadd.f32 %v923_v51, %v922_v49  ;;  %v682_v54 = vadd.f32 %v873_v46, %v1179_v56  ;;  %v698_v55 = vadd.f32 %v921_v47, %v1179_v56 }
 0x12b   :  { %v714_v57 = vmax.f32 %v682_v54, 0.0  ;;  %v730_v58 = vmax.f32 %v698_v55, 0.0  ;;  %v683_v59 = vadd.f32 %v876_v52, %v1179_v56  ;;  %v699_v60 = vadd.f32 %v924_v53, %v1179_v56 }
 0x12d   :  { %v877_v61 = vpop.f32.mrb[28].mxu0  ;;  %v925_v62 = vpop.f32.mrb[28].mxu1  ;;  %746 = vst [vmem:[%s1312_s3 + $0x60] sm:$0xff] %v714_v57  ;;  %762 = vst [vmem:[%s1312_s3 + $0xe0] sm:$0xff] %v730_v58  ;;  %v715_v1 = vmax.f32 %v683_v59, 0.0  ;;  %v731_v2 = vmax.f32 %v699_v60, 0.0 }
 0x12e   :  { %v878_v63 = vpop.f32.mrb[29].mxu0  ;;  %v926_v0 = vpop.f32.mrb[29].mxu1 }
 0x12f   :  { %v879_v3 = vadd.f32 %v878_v63, %v877_v61  ;;  %v927_v4 = vadd.f32 %v926_v0, %v925_v62  ;;  %v880_v5 = vpop.f32.mrb[30].mxu0  ;;  %v928_v6 = vpop.f32.mrb[30].mxu1  ;;  %747 = vst [vmem:[%s1312_s3 + $0x68] sm:$0xff] %v715_v1  ;;  %763 = vst [vmem:[%s1312_s3 + $0xe8] sm:$0xff] %v731_v2 }
 0x130   :  { %v881_v7 = vpop.f32.mrb[31].mxu0  ;;  %v929_v8 = vpop.f32.mrb[31].mxu1 }
 0x131   :  { %v882_v9 = vadd.f32 %v881_v7, %v880_v5  ;;  %v930_v10 = vadd.f32 %v929_v8, %v928_v6  ;;  %v684_v11 = vadd.f32 %v879_v3, %v1179_v56  ;;  %v700_v12 = vadd.f32 %v927_v4, %v1179_v56 }
 0x133   :  { %v716_v13 = vmax.f32 %v684_v11, 0.0  ;;  %v732_v14 = vmax.f32 %v700_v12, 0.0  ;;  %v685_v15 = vadd.f32 %v882_v9, %v1179_v56  ;;  %v701_v16 = vadd.f32 %v930_v10, %v1179_v56 }
 0x135   :  { %748 = vst [vmem:[%s1312_s3 + $0x70] sm:$0xff] %v716_v13  ;;  %764 = vst [vmem:[%s1312_s3 + $0xf0] sm:$0xff] %v732_v14  ;;  %v717_v17 = vmax.f32 %v685_v15, 0.0  ;;  %v733_v18 = vmax.f32 %v701_v16, 0.0 }
 0x137   :  { %749 = vst [vmem:[%s1312_s3 + $0x78] sm:$0xff] %v717_v17  ;;  %765 = vst [vmem:[%s1312_s3 + $0xf8] sm:$0xff] %v733_v18 }

</bundles_post_ra>
